<compile_context>
chip_gen: v5e
topology: v5e:2x2
jax: 0.10.0
libtpu: 0.0.40
codegen_flags: <defaults>
</compile_context>

<pallas_src>
import functools

import jax
import jax.numpy as jnp
from jax import lax
from jax.experimental import pallas as pl
from jax.experimental.pallas import tpu as pltpu


def se_kernel(x_ref, w1_ref, w2_ref, o_ref):
    x = x_ref[...]                                     # (Bt, C, HW)
    hw = x.shape[-1]

    # ---- squeeze: global average pool over the spatial (lane) axis ----
    pooled = jnp.sum(x, axis=-1, dtype=jnp.float32) * (1.0 / hw)       # (Bt, C)

    # ---- excite: fc1 -> relu -> fc2 -> sigmoid ----
    # PyTorch Linear weights are (out, in); contract over the `in` axis (C / Cr)
    # so no in-kernel transpose is needed.
    w1 = w1_ref[...].astype(jnp.float32)               # (Cr, C)
    w2 = w2_ref[...].astype(jnp.float32)               # (C, Cr)
    h = lax.dot_general(pooled, w1,
                        dimension_numbers=(((1,), (1,)), ((), ())),
                        preferred_element_type=jnp.float32)            # (Bt, Cr)
    h = jnp.maximum(h, 0.0)
    z = lax.dot_general(h, w2,
                        dimension_numbers=(((1,), (1,)), ((), ())),
                        preferred_element_type=jnp.float32)            # (Bt, C)
    s = 1.0 / (1.0 + jnp.exp(-z))                                      # sigmoid, (Bt, C)

    # ---- scale: per-channel rescale; multiply stays in x.dtype ----
    o_ref[...] = (x * s[..., None].astype(x.dtype)).astype(o_ref.dtype)


def _choose_bt(batch, block_bytes):
    """Pick images-per-step: ~4 MiB per x block, grid kept >= 2 when possible."""
    target = 4 << 20
    bt = max(1, target // max(block_bytes, 1))
    bt = min(bt, batch)
    if batch >= 2:
        bt = min(bt, max(1, batch // 2))   # keep >=2 grid steps for v7x dual-TC
    return int(bt)


@functools.partial(jax.jit, static_argnames=())
def se_forward(x_nchw, w_fc1, w_fc2):
    """x_nchw: (B, C, H, W); w_fc1: (C//r, C); w_fc2: (C, C//r) — PyTorch layout."""
    B, C, H, W = x_nchw.shape
    HW = H * W
    Cr = w_fc1.shape[0]
    itemsize = jnp.dtype(x_nchw.dtype).itemsize

    per_image_bytes = C * HW * itemsize
    Bt = _choose_bt(B, per_image_bytes)
    n_steps = pl.cdiv(B, Bt)
    B_pad = n_steps * Bt

    x = x_nchw.reshape(B, C, HW)                        # free: contiguous reshape
    if B_pad != B:
        x = jnp.pad(x, ((0, B_pad - B), (0, 0), (0, 0)))  # zeros are a fixed point of SE

    # VMEM budget: double-buffered input + output blocks + resident weights + slack.
    block_bytes = Bt * per_image_bytes
    w_bytes = (Cr * C + C * Cr) * jnp.dtype(w_fc1.dtype).itemsize
    vmem_needed = 4 * block_bytes + 2 * w_bytes + (2 << 20)
    vmem_limit = int(min(max(vmem_needed, 16 << 20), 48 << 20))   # v7x-safe cap

    cost = pl.CostEstimate(
        flops=int(4 * B_pad * Cr * C + 2 * B_pad * C * HW),
        transcendentals=int(B_pad * C),
        bytes_accessed=int(2 * B_pad * C * HW * itemsize + 2 * w_bytes),
    )

    out = pl.pallas_call(
        se_kernel,
        out_shape=jax.ShapeDtypeStruct((B_pad, C, HW), x.dtype),
        grid_spec=pltpu.PrefetchScalarGridSpec(
            num_scalar_prefetch=0,
            grid=(n_steps,),
            in_specs=[
                pl.BlockSpec((Bt, C, HW), lambda b: (b, 0, 0)),   # Bt images per step
                pl.BlockSpec((Cr, C), lambda b: (0, 0)),          # fc1 weight (resident)
                pl.BlockSpec((C, Cr), lambda b: (0, 0)),          # fc2 weight (resident)
            ],
            out_specs=pl.BlockSpec((Bt, C, HW), lambda b: (b, 0, 0)),
        ),
        compiler_params=pltpu.CompilerParams(
            dimension_semantics=("parallel",),
            vmem_limit_bytes=vmem_limit,
        ),
        cost_estimate=cost,
    )(x, w_fc1, w_fc2)

    return out[:B].reshape(B, C, H, W)


def reference_forward(x, w_fc1, w_fc2):
    """Pure-JAX reference matching the PyTorch SELayer forward."""
    y = jnp.mean(x, axis=(2, 3))                       # (B, C)
    y = jnp.maximum(y @ w_fc1.T, 0.0)                  # (B, Cr)
    y = 1.0 / (1.0 + jnp.exp(-(y @ w_fc2.T)))          # (B, C), sigmoid
    return x * y[:, :, None, None]


if __name__ == "__main__":
    key = jax.random.PRNGKey(0)
    B, C, H, W = 2, 64, 16, 16
    reduction = 16
    Cr = C // reduction                                 # 4

    kx, k1, k2 = jax.random.split(key, 3)
    x = jax.random.normal(kx, (B, C, H, W), jnp.float32)            # NCHW input
    w_fc1 = 0.2 * jax.random.normal(k1, (Cr, C), jnp.float32)       # Linear(C, C//r).weight
    w_fc2 = 0.2 * jax.random.normal(k2, (C, Cr), jnp.float32)       # Linear(C//r, C).weight

    out = se_forward(x, w_fc1, w_fc2)
    out = jax.block_until_ready(out)

    ref = reference_forward(x, w_fc1, w_fc2)
    assert out.shape == (B, C, H, W)
    err = jnp.max(jnp.abs(out - ref))
    assert jnp.allclose(out, ref, atol=1e-4, rtol=1e-4), f"max abs err {err}"
    print("KERNEL_OK")
</pallas_src>

<mosaic_0001>
module attributes {stable_mosaic.version = 11 : i64} {
  func.func @se_kernel(%arg0: i32, %arg1: memref<1x64x256xf32, #tpu.memory_space<vmem>>, %arg2: memref<4x64xf32, #tpu.memory_space<vmem>>, %arg3: memref<64x4xf32, #tpu.memory_space<vmem>>, %arg4: memref<1x64x256xf32, #tpu.memory_space<vmem>>) attributes {dimension_semantics = [#tpu.dimension_semantics<parallel>], iteration_bounds = array<i64: 2>, scalar_prefetch = 0 : i64, scratch_operands = 0 : i64, tpu.core_type = #tpu.core_type<tc>, window_params = [{transform_indices = @transform_0, window_bounds = array<i64: 1, 64, 256>}, {pipeline_mode = #tpu.pipeline_mode<synchronous>, transform_indices = @transform_1, window_bounds = array<i64: 4, 64>}, {pipeline_mode = #tpu.pipeline_mode<synchronous>, transform_indices = @transform_2, window_bounds = array<i64: 64, 4>}, {transform_indices = @transform_3, window_bounds = array<i64: 1, 64, 256>}]} {
    %c0 = arith.constant 0 : index
    %c0_0 = arith.constant 0 : index
    %c0_1 = arith.constant 0 : index
    %0 = vector.load %arg1[%c0, %c0_0, %c0_1] : memref<1x64x256xf32, #tpu.memory_space<vmem>>, vector<1x64x256xf32>
    %cst = arith.constant dense<0.000000e+00> : vector<1x64xf32>
    %1 = vector.multi_reduction <add>, %0, %cst [2] : vector<1x64x256xf32> to vector<1x64xf32>
    %cst_2 = arith.constant 3.906250e-03 : f32
    %2 = vector.broadcast %cst_2 : f32 to vector<1x64xf32>
    %3 = arith.mulf %1, %2 : vector<1x64xf32>
    %c0_3 = arith.constant 0 : index
    %c0_4 = arith.constant 0 : index
    %4 = vector.load %arg2[%c0_3, %c0_4] : memref<4x64xf32, #tpu.memory_space<vmem>>, vector<4x64xf32>
    %c0_5 = arith.constant 0 : index
    %c0_6 = arith.constant 0 : index
    %5 = vector.load %arg3[%c0_5, %c0_6] : memref<64x4xf32, #tpu.memory_space<vmem>>, vector<64x4xf32>
    %cst_7 = arith.constant dense<0.000000e+00> : vector<1x4xf32>
    %6 = tpu.matmul %3, %4, %cst_7 {dimension_numbers = #tpu.dot_dimension_numbers<[1], [1], [0], [0], [0, 0, 1, 0], [], []>} : vector<1x64xf32>, vector<4x64xf32>, vector<1x4xf32> -> vector<1x4xf32>
    %cst_8 = arith.constant 0.000000e+00 : f32
    %7 = vector.broadcast %cst_8 : f32 to vector<1x4xf32>
    %8 = arith.maximumf %6, %7 : vector<1x4xf32>
    %cst_9 = arith.constant dense<0.000000e+00> : vector<1x64xf32>
    %9 = tpu.matmul %8, %5, %cst_9 {dimension_numbers = #tpu.dot_dimension_numbers<[1], [1], [0], [0], [0, 0, 1, 0], [], []>} : vector<1x4xf32>, vector<64x4xf32>, vector<1x64xf32> -> vector<1x64xf32>
    %cst_10 = arith.constant 0.000000e+00 : f32
    %10 = vector.broadcast %cst_10 : f32 to vector<1x64xf32>
    %11 = arith.subf %10, %9 : vector<1x64xf32>
    %12 = math.exp %11 : vector<1x64xf32>
    %cst_11 = arith.constant 1.000000e+00 : f32
    %13 = vector.broadcast %cst_11 : f32 to vector<1x64xf32>
    %14 = arith.addf %13, %12 : vector<1x64xf32>
    %cst_12 = arith.constant 1.000000e+00 : f32
    %15 = vector.broadcast %cst_12 : f32 to vector<1x64xf32>
    %16 = arith.divf %15, %14 : vector<1x64xf32>
    %17 = vector.shape_cast %16 : vector<1x64xf32> to vector<1x64x1xf32>
    %18 = vector.broadcast %17 : vector<1x64x1xf32> to vector<1x64x256xf32>
    %19 = arith.mulf %0, %18 : vector<1x64x256xf32>
    %c0_13 = arith.constant 0 : index
    %c0_14 = arith.constant 0 : index
    %c0_15 = arith.constant 0 : index
    %20 = vector.load %arg4[%c0_13, %c0_14, %c0_15] : memref<1x64x256xf32, #tpu.memory_space<vmem>>, vector<1x64x256xf32>
    tpu.vector_store %arg4[%c0_13, %c0_14, %c0_15], %19 {strides = array<i32>} : memref<1x64x256xf32, #tpu.memory_space<vmem>>, vector<1x64x256xf32>,
    return
  }
  func.func @transform_0(%arg0: i32) -> (i32, i32, i32) {
    %c0_i32 = arith.constant 0 : i32
    %c0_i32_0 = arith.constant 0 : i32
    %c0_i32_1 = arith.constant 0 : i32
    return %arg0, %c0_i32, %c0_i32_0 : i32, i32, i32
  }
  func.func @transform_1(%arg0: i32) -> (i32, i32) {
    %c0_i32 = arith.constant 0 : i32
    %c0_i32_0 = arith.constant 0 : i32
    %c0_i32_1 = arith.constant 0 : i32
    return %c0_i32, %c0_i32_0 : i32, i32
  }
  func.func @transform_2(%arg0: i32) -> (i32, i32) {
    %c0_i32 = arith.constant 0 : i32
    %c0_i32_0 = arith.constant 0 : i32
    %c0_i32_1 = arith.constant 0 : i32
    return %c0_i32, %c0_i32_0 : i32, i32
  }
  func.func @transform_3(%arg0: i32) -> (i32, i32, i32) {
    %c0_i32 = arith.constant 0 : i32
    %c0_i32_0 = arith.constant 0 : i32
    %c0_i32_1 = arith.constant 0 : i32
    return %arg0, %c0_i32, %c0_i32_0 : i32, i32, i32
  }
}

</mosaic_0001>

<bundles_post_ra>
// kernel: se_forward.1
= control target key start
LH: loop header
LB: loop body
LE: loop exit
PB: predicated region body
PF: predicated region fallthrough
CT: control target
= control target key end

     0   :  { %s570_s12 = smov 0   ;;  %s714_s0 = inlined_call_operand.vmem [shape: f32[2,64,256], index: 0, kind: input, shape index: {}]   ;;  %s715_s1 = inlined_call_operand.vmem [shape: f32[4,64], index: 1, kind: input, shape index: {}]   ;;  %s716_s2 = inlined_call_operand.vmem [shape: f32[64,4], index: 2, kind: input, shape index: {}]   ;;  %s717_s3 = inlined_call_operand.vmem [shape: f32[2,64,256], index: 3, kind: output, shape index: {}]  }
   0x1 LB: > { %s497_s13 = sadd.s32 4294967295, %s548_s12   ;;  %p501_p0 = scmp.ge.s32.totalorder %s548_s12, 1  ;;  %s548_s12 = sphi %s570_s12, %s13_s12  }
   0x2   : > { %p137_p1 = scmp.lt.s32.totalorder %s548_s12, 3 }
   0x4   : > { %p138_p2 = pnand %p501_p0, %p137_p1 }
   0x5   : > { %p161_p3 = scmp.lt.s32.totalorder (!%p138_p2), %s497_s13, 1 }
   0x6   : > { %141 = sbr.rel (%p138_p2) target bundleno = 592 (0x250), region = 32 }
   0xb   : > { %s719_s13 = smov (!%p161_p3, %s497_s13), 1  ;;  %v219_v24 = vld [vmem:[%s715_s1] sm:$0xf]  ;;  %vm267_vm0 = vcmask 523264   ;;  %v227_v25 = vld [vmem:[%s716_s2 + $0x38] sm:$0xff]  ;;  %vm294_vm1 = vcmask 31744   ;;  %v236_v28 = vlaneseq }
   0xc   : > { %s519_s14 = sshll.u32 %s719_s13, 7  ;;  %506 = vmatpush.xpose.msk.msra.mxu0 %vm267_vm0, %v219_v24  ;;  %508 = vmatpush.xpose.msk.msra.mxu1 %vm294_vm1, %v227_v25  ;;  %v226_v26 = vld [vmem:[%s716_s2 + $0x30] sm:$0xff]  ;;  %v225_v27 = vld [vmem:[%s716_s2 + $0x28] sm:$0xff]  ;;  %v224_v32 = vld [vmem:[%s716_s2 + $0x20] sm:$0xff]  ;;  %vm241_vm2 = vcmask 130112   ;;  %vm245_vm3 = vcmask 195712  }
   0xd   : > { %s165_s17 = scalar_lea.vmem %s714_s0, %s519_s14  ;;  %v237_v33 = vand.u32 127, %v236_v28  ;;  %v223_v34 = vld [vmem:[%s716_s2 + $0x18] sm:$0xff]  ;;  %v222_v44 = vld [vmem:[%s716_s2 + $0x10] sm:$0xff]  ;;  %vm249_vm4 = vcmask 261312   ;;  %v221_v55 = vld [vmem:[%s716_s2 + $0x8] sm:$0xff]  ;;  %vm253_vm5 = vcmask 326912   ;;  %s677_s11 = scalar_lea.vmem %s717_s3, %s519_s14 }
   0xe   : > { %v586_v0 = vld [vmem:[%s165_s17] sm:$0xff]  ;;  %v588_v1 = vld [vmem:[%s165_s17 + $0x8] sm:$0xff]  ;;  %v604_v9 = vld [vmem:[%s165_s17 + $0x10] sm:$0xff]  ;;  %vm257_vm6 = vcmask 392512   ;;  %vm261_vm7 = vcmask 458112   ;;  %vm265_vm8 = vcmask 523712  }
   0xf   : > { %v590_v2 = vld [vmem:[%s165_s17 + $0x20] sm:$0xff]  ;;  %v187_v3 = vadd.f32 %v588_v1, %v586_v0  ;;  %v594_v4 = vld [vmem:[%s165_s17 + $0x28] sm:$0xff]  ;;  %v606_v10 = vld [vmem:[%s165_s17 + $0x18] sm:$0xff]  ;;  %v239_v36 = vadd.s32 4294967288, %v237_v33  ;;  %v243_v37 = vadd.s32 4294967280, %v237_v33  ;;  %v247_v40 = vadd.s32 4294967272, %v237_v33 }
  0x10   : > { %v596_v5 = vld [vmem:[%s165_s17 + $0x40] sm:$0xff]  ;;  %v598_v6 = vld [vmem:[%s165_s17 + $0x48] sm:$0xff]  ;;  %v193_v7 = vadd.f32 %v594_v4, %v590_v2  ;;  %v608_v11 = vld [vmem:[%s165_s17 + $0x30] sm:$0xff]  ;;  %v190_v15 = vadd.f32 %v606_v10, %v604_v9  ;;  %509 = vmatpush.xpose.msk.msra.mxu1 %vm294_vm1, %v226_v26  ;;  %v251_v45 = vadd.s32 4294967264, %v237_v33  ;;  %v255_v52 = vadd.s32 4294967256, %v237_v33 }
  0x11   : > { %v199_v8 = vadd.f32 %v598_v6, %v596_v5  ;;  %188 = vadd.xlane.f32.xlu0 %v187_v3  ;;  %v610_v12 = vld [vmem:[%s165_s17 + $0x38] sm:$0xff]  ;;  %v612_v13 = vld [vmem:[%s165_s17 + $0x50] sm:$0xff]  ;;  %v622_v18 = vld [vmem:[%s165_s17 + $0x60] sm:$0xff]  ;;  %v259_v59 = vadd.s32 4294967248, %v237_v33  ;;  %v263_v62 = vadd.s32 4294967240, %v237_v33 }
  0x12   : > { %194 = vadd.xlane.f32.xlu1 %v193_v7  ;;  %v614_v14 = vld [vmem:[%s165_s17 + $0x58] sm:$0xff]  ;;  %v196_v16 = vadd.f32 %v610_v12, %v608_v11  ;;  %v624_v19 = vld [vmem:[%s165_s17 + $0x68] sm:$0xff]  ;;  %v626_v20 = vld [vmem:[%s165_s17 + $0x70] sm:$0xff] }
  0x13   : > { %200 = vadd.xlane.f32.xlu2 %v199_v8  ;;  %v202_v17 = vadd.f32 %v614_v14, %v612_v13  ;;  %v628_v21 = vld [vmem:[%s165_s17 + $0x78] sm:$0xff]  ;;  %v205_v22 = vadd.f32 %v624_v19, %v622_v18  ;;  %v220_v24 = vld [vmem:[%s716_s2] sm:$0xff] }
  0x14   : > { %v208_v23 = vadd.f32 %v628_v21, %v626_v20  ;;  %510 = vmatpush.xpose.msk.msra.mxu1 %vm294_vm1, %v225_v27  ;;  %v363_v27 = vshrl.u32 %v236_v28, 7 }
  0x16   : > { %529 = vset.pattern.permute.xlu2 %v363_v27 }
  0x18   : > { %511 = vmatpush.xpose.msk.msra.mxu1 %vm294_vm1, %v224_v32 }
  0x19   : > { %191 = vadd.xlane.f32.xlu0 %v190_v15 }
  0x1a   : > { %197 = vadd.xlane.f32.xlu1 %v196_v16 }
  0x1b   : > { %203 = vadd.xlane.f32.xlu2 %v202_v17 }
  0x1c   : > { %512 = vmatpush.xpose.msk.msra.mxu1 %vm294_vm1, %v223_v34 }
  0x20   : > { %513 = vmatpush.xpose.msk.msra.mxu1 %vm294_vm1, %v222_v44 }
  0x21   : > { %206 = vadd.xlane.f32.xlu0 %v205_v22 }
  0x22   : > { %209 = vadd.xlane.f32.xlu1 %v208_v23 }
  0x24   : > { %514 = vmatpush.xpose.msk.msra.mxu1 %vm294_vm1, %v221_v55 }
  0x28   : > { %515 = vmatpush.xpose.msk.msra.mxu1 %vm294_vm1, %v220_v24 }
  0x84   : > { %v189_v29 = vpop.xlane.xlu0 %188 }
  0x85   : > { %v195_v30 = vpop.xlane.xlu1 %194  ;;  %v211_v35 = vmul.f32 0.00390625, %v189_v29  ;;  %v376_v29 = vadd.s32 16, %v363_v27 }
  0x86   : > { %v201_v31 = vpop.xlane.xlu2 %200  ;;  %v213_v38 = vmul.f32 0.00390625, %v195_v30  ;;  %v370_v30 = vadd.s32 8, %v363_v27 }
  0x87   : > { %v238_v47 = vperm.slane %v211_v35, %v237_v33  ;;  %v215_v48 = vmul.f32 0.00390625, %v201_v31  ;;  %531 = vset.pattern.permute.xlu1 %v376_v29 }
  0x88   : > { %v244_v50 = vperm.slane %v213_v38, %v243_v37  ;;  %530 = vset.pattern.permute.xlu0 %v370_v30 }
  0x89   : > { %v252_v57 = vperm.slane %v215_v48, %v251_v45  ;;  %v406_v48 = vadd.s32 56, %v363_v27 }
  0x8c   : > { %v192_v39 = vpop.xlane.xlu0 %191 }
  0x8d   : > { %v212_v41 = vmul.f32 0.00390625, %v192_v39  ;;  %v198_v42 = vpop.xlane.xlu1 %197 }
  0x8e   : > { %v204_v43 = vpop.xlane.xlu2 %203  ;;  %v214_v46 = vmul.f32 0.00390625, %v198_v42 }
  0x8f   : > { %v240_v49 = vperm.slane %v212_v41, %v239_v36  ;;  %v216_v53 = vmul.f32 0.00390625, %v204_v43 }
  0x90   : > { %v248_v51 = vperm.slane %v214_v46, %v247_v40  ;;  %v394_v46 = vadd.s32 40, %v363_v27 }
  0x91   : > { %v242_v54 = vsel %vm241_vm2, %v240_v49, %v238_v47  ;;  %v256_v60 = vperm.slane %v216_v53, %v255_v52  ;;  %v382_v47 = vadd.s32 24, %v363_v27  ;;  %v388_v49 = vadd.s32 32, %v363_v27 }
  0x92   : > { %v246_v56 = vsel %vm245_vm3, %v244_v50, %v242_v54  ;;  %v400_v50 = vadd.s32 48, %v363_v27 }
  0x93   : > { %v250_v58 = vsel %vm249_vm4, %v248_v51, %v246_v56 }
  0x94   : > { %v207_v61 = vpop.xlane.xlu0 %206  ;;  %v254_v7 = vsel %vm253_vm5, %v252_v57, %v250_v58 }
  0x95   : > { %v217_v63 = vmul.f32 0.00390625, %v207_v61  ;;  %v210_v3 = vpop.xlane.xlu1 %209  ;;  %v258_v17 = vsel %vm257_vm6, %v256_v60, %v254_v7 }
  0x96   : > { %v218_v8 = vmul.f32 0.00390625, %v210_v3 }
  0x97   : > { %v260_v15 = vperm.slane %v217_v63, %v259_v59 }
  0x98   : > { %v264_v16 = vperm.slane %v218_v8, %v263_v62 }
  0x99   : > { %v262_v22 = vsel %vm261_vm7, %v260_v15, %v258_v17 }
  0x9a   : > { %v266_v23 = vsel %vm265_vm8, %v264_v16, %v262_v22 }
  0x9b   : > { %507 = vmatmul.msk.f32.vlgmr.msra.gmra.mxu0 %vm267_vm0, %v266_v23 }
 0x118   : > { %v290_v25 = vpop.f32.mrf.mxu0 }
 0x119   : > { %v293_v26 = vmax.f32 %v290_v25, 0.0 }
 0x11b   : > { %516 = vmatmul.msk.f32.vlgmr.msra.gmra.mxu1 %vm294_vm1, %v293_v26 }
 0x198   : > { %v339_v31 = vpop.f32.mrf.mxu1 }
 0x199   : > { %v342_v32 = vsub.f32 0.0, %v339_v31 }
 0x19b   : > { %v343_v33 = vmul.f32 1.442695, %v342_v32 }
 0x19d   : > { %538 = vpow2.f32 %v343_v33 }
 0x1a3   : > { %v539_v34 = vpop.eup %538 }
 0x1a4   : > { %v345_v35 = vadd.f32 1.0, %v539_v34 }
 0x1a6   : > { %540 = vrcp.f32 %v345_v35  ;;  %v357_v39 = vand.u32 2147483648, %v345_v35  ;;  %v355_v41 = vand.u32 2147483647, %v345_v35  ;;  %vm351_vm10 = vweird.f32 %v345_v35 }
 0x1a8   : > { %v358_v42 = vor.u32 1.1754944e-38, %v357_v39  ;;  %vm356_vm12 = vcmp.eq.f32.partialorder %v355_v41, 8.507059e+37 }
 0x1ac   : > { %v541_v36 = vpop.eup %540 }
 0x1ad   : > { %v347_v37 = vmul.f32 %v541_v36, %v345_v35  ;;  %vm352_vm9 = vweird.f32 %v541_v36 }
 0x1ae   : > { %vm353_vm11 = vmor %vm351_vm10, %vm352_vm9 }
 0x1af   : > { %v348_v38 = vsub.f32 1.0, %v347_v37 }
 0x1b1   : > { %v349_v40 = vmul.f32 %v541_v36, %v348_v38 }
 0x1b3   : > { %v350_v28 = vadd.f32 %v541_v36, %v349_v40 }
 0x1b5   : > { %v354_v43 = vsel %vm353_vm11, %v541_v36, %v350_v28 }
 0x1b6   : > { %v359_v44 = vsel %vm356_vm12, %v358_v42, %v354_v43 }
 0x1b7   : > { %v361_v45 = vperm.slane %v359_v44, 0 }
 0x1b9   : > { %378 = vperm.xlu1 %531, %v361_v45   ;;  %372 = vperm.xlu0 %530, %v361_v45  }
 0x1ba   : > { %366 = vperm.xlu2 %529, %v361_v45  }
 0x1c1   : > { %534 = vset.pattern.permute.xlu1 %v394_v46  ;;  %537 = vset.pattern.permute.xlu0 %v406_v48 }
 0x1c2   : > { %532 = vset.pattern.permute.xlu2 %v382_v47 }
 0x1c9   : > { %396 = vperm.xlu1 %534, %v361_v45  }
 0x1ca   : > { %384 = vperm.xlu2 %532, %v361_v45  }
 0x1d1   : > { %536 = vset.pattern.permute.xlu1 %v406_v48 }
 0x1d2   : > { %533 = vset.pattern.permute.xlu2 %v388_v49 }
 0x1d9   : > { %408 = vperm.xlu1 %536, %v361_v45  }
 0x1da   : > { %390 = vperm.xlu2 %533, %v361_v45  }
 0x1e2   : > { %535 = vset.pattern.permute.xlu2 %v400_v50 }
 0x1ea   : > { %402 = vperm.xlu2 %535, %v361_v45  }
 0x214   : > { %v367_v51 = vpop.permute.xlu2 %366 }
 0x215   : > { %v410_v52 = vmul.f32 %v367_v51, %v586_v0  ;;  %v411_v53 = vmul.f32 %v367_v51, %v588_v1 }
 0x217   : > { %426 = vst [vmem:[%s677_s11] sm:$0xff] %v410_v52 }
 0x218   : > { %427 = vst [vmem:[%s677_s11 + $0x8] sm:$0xff] %v411_v53 }
 0x224   : > { %v385_v54 = vpop.permute.xlu2 %384 }
 0x225   : > { %v416_v55 = vmul.f32 %v385_v54, %v608_v11  ;;  %v417_v56 = vmul.f32 %v385_v54, %v610_v12 }
 0x227   : > { %432 = vst [vmem:[%s677_s11 + $0x30] sm:$0xff] %v416_v55 }
 0x228   : > { %433 = vst [vmem:[%s677_s11 + $0x38] sm:$0xff] %v417_v56 }
 0x22b   : > { %v379_v57 = vpop.permute.xlu1 %378  ;;  %v373_v58 = vpop.permute.xlu0 %372 }
 0x22c   : > { %v414_v0 = vmul.f32 %v379_v57, %v590_v2  ;;  %v415_v1 = vmul.f32 %v379_v57, %v594_v4  ;;  %v412_v59 = vmul.f32 %v373_v58, %v604_v9  ;;  %v413_v60 = vmul.f32 %v373_v58, %v606_v10 }
 0x22e   : > { %430 = vst [vmem:[%s677_s11 + $0x20] sm:$0xff] %v414_v0 }
 0x22f   : > { %431 = vst [vmem:[%s677_s11 + $0x28] sm:$0xff] %v415_v1 }
 0x230   : > { %428 = vst [vmem:[%s677_s11 + $0x10] sm:$0xff] %v412_v59 }
 0x231   : > { %429 = vst [vmem:[%s677_s11 + $0x18] sm:$0xff] %v413_v60 }
 0x234   : > { %v391_v11 = vpop.permute.xlu2 %390 }
 0x235   : > { %v418_v12 = vmul.f32 %v391_v11, %v596_v5  ;;  %v419_v61 = vmul.f32 %v391_v11, %v598_v6 }
 0x237   : > { %434 = vst [vmem:[%s677_s11 + $0x40] sm:$0xff] %v418_v12 }
 0x238   : > { %435 = vst [vmem:[%s677_s11 + $0x48] sm:$0xff] %v419_v61 }
 0x23b   : > { %v397_v2 = vpop.permute.xlu1 %396 }
 0x23c   : > { %v420_v4 = vmul.f32 %v397_v2, %v612_v13  ;;  %v421_v9 = vmul.f32 %v397_v2, %v614_v14 }
 0x23e   : > { %436 = vst [vmem:[%s677_s11 + $0x50] sm:$0xff] %v420_v4 }
 0x23f   : > { %437 = vst [vmem:[%s677_s11 + $0x58] sm:$0xff] %v421_v9 }
 0x244   : > { %v403_v10 = vpop.permute.xlu2 %402 }
 0x245   : > { %v422_v62 = vmul.f32 %v403_v10, %v622_v18  ;;  %v423_v63 = vmul.f32 %v403_v10, %v624_v19 }
 0x247   : > { %438 = vst [vmem:[%s677_s11 + $0x60] sm:$0xff] %v422_v62 }
 0x248   : > { %439 = vst [vmem:[%s677_s11 + $0x68] sm:$0xff] %v423_v63 }
 0x24b   : > { %v409_v5 = vpop.permute.xlu1 %408 }
 0x24c   : > { %v424_v6 = vmul.f32 %v409_v5, %v626_v20  ;;  %v425_v3 = vmul.f32 %v409_v5, %v628_v21 }
 0x24e   : > { %440 = vst [vmem:[%s677_s11 + $0x70] sm:$0xff] %v424_v6 }
 0x24f   : > { %441 = vst [vmem:[%s677_s11 + $0x78] sm:$0xff] %v425_v3 }
 0x250 PF: > { %s13_s12 = sadd.s32 1, %s548_s12  }
 0x251   : > { %p10_p4 = scmp.ge.s32.totalorder %s13_s12, 4  }
 0x253   :  { %12 = sbr.rel (!%p10_p4) target bundleno = 1 (0x1), region = 62 }

</bundles_post_ra>
